<compile_context>
chip_gen: v5e
topology: v5e:2x2
jax: 0.10.0
libtpu: 0.0.40
codegen_flags: <defaults>
</compile_context>

<pallas_src>
import math

import jax
import jax.numpy as jnp
from jax import lax
from jax.experimental import pallas as pl
from jax.experimental.pallas import tpu as pltpu


# ----------------------------------------------------------------------------
# Kernel 1: fused K / V linear projections (x @ W^T + b, torch nn.Linear).
# Weights arrive pre-transposed as (in_features, out_features).
# ----------------------------------------------------------------------------
def kv_projection_kernel(k_ref, v_ref, wk_ref, bk_ref, wv_ref, bv_ref,
                         kp_ref, vp_ref):
    kp_ref[...] = (jnp.dot(k_ref[...], wk_ref[...],
                           preferred_element_type=jnp.float32)
                   + bk_ref[...]).astype(kp_ref.dtype)
    vp_ref[...] = (jnp.dot(v_ref[...], wv_ref[...],
                           preferred_element_type=jnp.float32)
                   + bv_ref[...]).astype(vp_ref.dtype)


def project_kv(K, V, wk_t, bk, wv_t, bv, *, k_tile, vmem_limit):
    B, Sk, D = K.shape
    TK = k_tile
    seq_spec = pl.BlockSpec((None, TK, D), lambda b, s: (b, s, 0))
    w_spec = pl.BlockSpec((D, D), lambda b, s: (0, 0))
    b_spec = pl.BlockSpec((1, D), lambda b, s: (0, 0))
    return pl.pallas_call(
        kv_projection_kernel,
        out_shape=(jax.ShapeDtypeStruct((B, Sk, D), K.dtype),
                   jax.ShapeDtypeStruct((B, Sk, D), V.dtype)),
        grid_spec=pltpu.PrefetchScalarGridSpec(
            num_scalar_prefetch=0,
            grid=(B, Sk // TK),
            in_specs=[seq_spec, seq_spec, w_spec, b_spec, w_spec, b_spec],
            out_specs=(seq_spec, seq_spec),
        ),
        compiler_params=pltpu.CompilerParams(
            dimension_semantics=("parallel", "parallel"),
            vmem_limit_bytes=vmem_limit),
    )(K, V, wk_t, bk, wv_t, bv)


# ----------------------------------------------------------------------------
# Kernel 2: flash-style attention + fused fc_out projection.
# ----------------------------------------------------------------------------
def make_flash_mha_kernel(num_heads: int, head_dim: int):
    inv_sqrt_hd = 1.0 / math.sqrt(head_dim)

    def kernel(q_ref, kp_ref, vp_ref, wq_ref, bq_ref, wo_ref, bo_ref, o_ref,
               qp_sc, m_sc, l_sc, acc_sc):
        ki = pl.program_id(2)

        @pl.when(ki == 0)
        def _init():
            # Q projection for this (batch, q-tile): done once, reused over
            # all Sk steps.  1/sqrt(head_dim) is folded in here.
            qp_sc[...] = ((jnp.dot(q_ref[...], wq_ref[...],
                                   preferred_element_type=jnp.float32)
                           + bq_ref[...]) * inv_sqrt_hd)
            m_sc[...] = jnp.full(m_sc.shape, -jnp.inf, dtype=jnp.float32)
            l_sc[...] = jnp.zeros(l_sc.shape, dtype=jnp.float32)
            acc_sc[...] = jnp.zeros(acc_sc.shape, dtype=jnp.float32)

        kp = kp_ref[...]
        vp = vp_ref[...]
        # Cast once per K/V step so QK^T runs in the input (e.g. bf16) dtype.
        qp = qp_sc[...].astype(kp.dtype)

        # Online-softmax update of every head against this K/V tile.
        # Softmax math stays f32 (v5e has no bf16 VPU/EUP path anyway).
        for h in range(num_heads):
            lo = h * head_dim
            hi = lo + head_dim
            qh = qp[:, lo:hi]             # (TQ, hd)
            kh = kp[:, lo:hi]             # (TK, hd)
            vh = vp[:, lo:hi]             # (TK, hd)

            # scores = qh @ kh^T, expressed as a contraction (no transpose).
            s = lax.dot_general(
                qh, kh, (((1,), (1,)), ((), ())),
                preferred_element_type=jnp.float32)       # (TQ, TK) f32
            # TODO(synk): optional attention mask (mask=None path only).

            m_prev = m_sc[:, h:h + 1]                                # (TQ, 1)
            m_new = jnp.maximum(m_prev, jnp.max(s, axis=-1, keepdims=True))
            alpha = jnp.exp(m_prev - m_new)
            p = jnp.exp(s - m_new)                                   # f32

            l_sc[:, h:h + 1] = (alpha * l_sc[:, h:h + 1]
                                + jnp.sum(p, axis=-1, keepdims=True))
            acc_sc[:, lo:hi] = alpha * acc_sc[:, lo:hi] + jnp.dot(
                p.astype(vh.dtype), vh, preferred_element_type=jnp.float32)
            m_sc[:, h:h + 1] = m_new

        # Last K/V tile: normalize each head (exact f32 divide, no approx
        # reciprocal), then fold the head-packed (TQ, D) output through fc_out
        # with ONE full-contraction matmul and a lane-dense store.
        @pl.when(ki == pl.num_programs(2) - 1)
        def _finalize():
            for h in range(num_heads):
                lo = h * head_dim
                hi = lo + head_dim
                inv_l = 1.0 / l_sc[:, h:h + 1]            # exact
                acc_sc[:, lo:hi] = acc_sc[:, lo:hi] * inv_l
            o_norm = acc_sc[...]                          # (TQ, D) f32
            out = jnp.dot(o_norm.astype(wo_ref.dtype), wo_ref[...],
                          preferred_element_type=jnp.float32)
            o_ref[...] = (out + bo_ref[...]).astype(o_ref.dtype)

    return kernel


def multi_head_attention(Q, K, V, params, num_heads: int,
                         *, q_tile: int = 256, k_tile: int = 256):
    """Q: (B, Sq, D), K/V: (B, Sk, D). Returns (B, Sq, D)."""
    B, Sq, D = Q.shape
    _, Sk, _ = K.shape
    assert D % num_heads == 0
    head_dim = D // num_heads

    # Tile sizes (fall back to full extent when not divisible).
    # TODO(synk): add a padded/masked partial-tile path for very long
    #             non-divisible sequences instead of one huge fallback tile.
    TQ = q_tile if Sq % q_tile == 0 else Sq
    TK = k_tile if Sk % k_tile == 0 else Sk

    # Pre-transpose all projection weights to (in_features, out_features):
    # layout plumbing on the host, removes all in-kernel XLU transposes.
    wq_t = params["wq"].T
    wk_t = params["wk"].T
    wv_t = params["wv"].T
    wo_t = params["wo"].T
    bq, bk, bv, bo = params["bq"], params["bk"], params["bv"], params["bo"]

    itemsize = jnp.dtype(Q.dtype).itemsize
    # Rough per-step VMEM budget: double-buffered streaming tiles + resident
    # weights + f32 scratch, with 2x headroom; clamped so it also fits v7x
    # (64 MiB per TensorCore).
    est = (2 * TQ * D * itemsize                       # Q tile
           + 2 * 2 * TK * D * itemsize                 # projected K, V tiles
           + 2 * TQ * D * itemsize                     # output tile
           + 2 * 2 * (D * D + D) * itemsize            # Wq^T,bq,Wo^T,bo
           + 2 * TQ * D * 4                            # qp + acc scratch
           + 2 * TQ * num_heads * 4)                   # m, l scratch
    vmem_limit = int(min(max(2 * est, 32 * 1024 * 1024), 48 * 1024 * 1024))

    # 1) K / V projections (fused, tiled over Sk).
    Kp, Vp = project_kv(K, V, wk_t, bk, wv_t, bv,
                        k_tile=TK, vmem_limit=vmem_limit)

    # 2) Flash attention + fc_out.
    kernel = make_flash_mha_kernel(num_heads, head_dim)

    q_spec = pl.BlockSpec((None, TQ, D), lambda b, qi, ki: (b, qi, 0))
    kv_spec = pl.BlockSpec((None, TK, D), lambda b, qi, ki: (b, ki, 0))
    w_spec = pl.BlockSpec((D, D), lambda b, qi, ki: (0, 0))
    b_spec = pl.BlockSpec((1, D), lambda b, qi, ki: (0, 0))

    return pl.pallas_call(
        kernel,
        out_shape=jax.ShapeDtypeStruct((B, Sq, D), Q.dtype),
        grid_spec=pltpu.PrefetchScalarGridSpec(
            num_scalar_prefetch=0,
            grid=(B, Sq // TQ, Sk // TK),
            in_specs=[q_spec, kv_spec, kv_spec,
                      w_spec, b_spec,        # query projection
                      w_spec, b_spec],       # fc_out
            out_specs=q_spec,
            scratch_shapes=[
                pltpu.VMEM((TQ, D), jnp.float32),          # scaled Q proj
                pltpu.VMEM((TQ, num_heads), jnp.float32),  # running max
                pltpu.VMEM((TQ, num_heads), jnp.float32),  # running sum
                pltpu.VMEM((TQ, D), jnp.float32),          # running PV (head-packed)
            ]),
        compiler_params=pltpu.CompilerParams(
            dimension_semantics=("parallel", "parallel", "arbitrary"),
            vmem_limit_bytes=vmem_limit),
    )(Q, Kp, Vp, wq_t, bq, wo_t, bo)


def reference_mha(Q, K, V, params, num_heads: int):
    """Pure-JAX reference mirroring the PyTorch forward pass."""
    B, Sq, D = Q.shape
    _, Sk, _ = K.shape
    hd = D // num_heads
    q = Q @ params["wq"].T + params["bq"]
    k = K @ params["wk"].T + params["bk"]
    v = V @ params["wv"].T + params["bv"]
    q = q.reshape(B, Sq, num_heads, hd).transpose(0, 2, 1, 3)
    k = k.reshape(B, Sk, num_heads, hd).transpose(0, 2, 1, 3)
    v = v.reshape(B, Sk, num_heads, hd).transpose(0, 2, 1, 3)
    scores = jnp.einsum("bhqd,bhkd->bhqk", q, k) / math.sqrt(hd)
    attn = jax.nn.softmax(scores, axis=-1)
    out = jnp.einsum("bhqk,bhkd->bhqd", attn, v)
    out = out.transpose(0, 2, 1, 3).reshape(B, Sq, D)
    return out @ params["wo"].T + params["bo"]


if __name__ == "__main__":
    # 128-lane-aligned shapes that exercise the tiled grid:
    #   attention grid = (B, Sq/TQ, Sk/TK) = (2, 2, 2), K/V projection = (2, 2)
    #   B * Sq/TQ = 4 parallel blocks (enough to feed v7x's 2 TensorCores).
    B, Sq, Sk, D, H = 2, 512, 512, 128, 4

    key = jax.random.PRNGKey(0)
    ks = jax.random.split(key, 11)

    def init_w(k):  # torch nn.Linear weight layout: (out_features, in_features)
        return jax.random.normal(k, (D, D), dtype=jnp.float32) * 0.1

    def init_b(k):
        return jax.random.normal(k, (1, D), dtype=jnp.float32) * 0.1

    params = {
        "wq": init_w(ks[0]), "bq": init_b(ks[1]),
        "wk": init_w(ks[2]), "bk": init_b(ks[3]),
        "wv": init_w(ks[4]), "bv": init_b(ks[5]),
        "wo": init_w(ks[6]), "bo": init_b(ks[7]),
    }

    Q = jax.random.normal(ks[8], (B, Sq, D), dtype=jnp.float32)
    K = jax.random.normal(ks[9], (B, Sk, D), dtype=jnp.float32)
    V = jax.random.normal(ks[10], (B, Sk, D), dtype=jnp.float32)

    out = multi_head_attention(Q, K, V, params, num_heads=H)
    out = jax.block_until_ready(out)

    ref = reference_mha(Q, K, V, params, num_heads=H)
    assert out.shape == (B, Sq, D)
    max_diff = float(jnp.max(jnp.abs(out - ref)))
    assert jnp.allclose(out, ref, atol=2e-3, rtol=2e-3), (
        "mismatch vs reference: max abs diff = %f" % max_diff)

    print("KERNEL_OK")
</pallas_src>

<mosaic_0001>
module attributes {stable_mosaic.version = 11 : i64} {
  func.func @kv_projection_kernel(%arg0: i32, %arg1: i32, %arg2: memref<1x256x128xf32, #tpu.memory_space<vmem>>, %arg3: memref<1x256x128xf32, #tpu.memory_space<vmem>>, %arg4: memref<128x128xf32, #tpu.memory_space<vmem>>, %arg5: memref<1x128xf32, #tpu.memory_space<vmem>>, %arg6: memref<128x128xf32, #tpu.memory_space<vmem>>, %arg7: memref<1x128xf32, #tpu.memory_space<vmem>>, %arg8: memref<1x256x128xf32, #tpu.memory_space<vmem>>, %arg9: memref<1x256x128xf32, #tpu.memory_space<vmem>>) attributes {dimension_semantics = [#tpu.dimension_semantics<parallel>, #tpu.dimension_semantics<parallel>], iteration_bounds = array<i64: 2, 2>, scalar_prefetch = 0 : i64, scratch_operands = 0 : i64, tpu.core_type = #tpu.core_type<tc>, window_params = [{transform_indices = @transform_0, window_bounds = array<i64: 1, 256, 128>}, {transform_indices = @transform_1, window_bounds = array<i64: 1, 256, 128>}, {pipeline_mode = #tpu.pipeline_mode<synchronous>, transform_indices = @transform_2, window_bounds = array<i64: 128, 128>}, {pipeline_mode = #tpu.pipeline_mode<synchronous>, transform_indices = @transform_3, window_bounds = array<i64: 1, 128>}, {pipeline_mode = #tpu.pipeline_mode<synchronous>, transform_indices = @transform_4, window_bounds = array<i64: 128, 128>}, {pipeline_mode = #tpu.pipeline_mode<synchronous>, transform_indices = @transform_5, window_bounds = array<i64: 1, 128>}, {transform_indices = @transform_6, window_bounds = array<i64: 1, 256, 128>}, {transform_indices = @transform_7, window_bounds = array<i64: 1, 256, 128>}]} {
    %c0 = arith.constant 0 : index
    %c0_0 = arith.constant 0 : index
    %c0_1 = arith.constant 0 : index
    %0 = vector.load %arg2[%c0, %c0_0, %c0_1] : memref<1x256x128xf32, #tpu.memory_space<vmem>>, vector<1x256x128xf32>
    %1 = vector.shape_cast %0 : vector<1x256x128xf32> to vector<256x128xf32>
    %c0_2 = arith.constant 0 : index
    %c0_3 = arith.constant 0 : index
    %2 = vector.load %arg4[%c0_2, %c0_3] : memref<128x128xf32, #tpu.memory_space<vmem>>, vector<128x128xf32>
    %cst = arith.constant dense<0.000000e+00> : vector<256x128xf32>
    %3 = tpu.matmul %1, %2, %cst {dimension_numbers = #tpu.dot_dimension_numbers<[1], [0], [0], [1], [0, 0, 1, 1], [], []>} : vector<256x128xf32>, vector<128x128xf32>, vector<256x128xf32> -> vector<256x128xf32>
    %c0_4 = arith.constant 0 : index
    %c0_5 = arith.constant 0 : index
    %4 = vector.load %arg5[%c0_4, %c0_5] : memref<1x128xf32, #tpu.memory_space<vmem>>, vector<1x128xf32>
    %5 = vector.broadcast %4 : vector<1x128xf32> to vector<256x128xf32>
    %6 = arith.addf %3, %5 : vector<256x128xf32>
    %c0_6 = arith.constant 0 : index
    %c0_7 = arith.constant 0 : index
    %c0_8 = arith.constant 0 : index
    %7 = vector.load %arg8[%c0_6, %c0_7, %c0_8] : memref<1x256x128xf32, #tpu.memory_space<vmem>>, vector<1x256x128xf32>
    %8 = vector.shape_cast %7 : vector<1x256x128xf32> to vector<256x128xf32>
    %9 = vector.shape_cast %6 : vector<256x128xf32> to vector<1x256x128xf32>
    tpu.vector_store %arg8[%c0_6, %c0_7, %c0_8], %9 {strides = array<i32>} : memref<1x256x128xf32, #tpu.memory_space<vmem>>, vector<1x256x128xf32>,
    %c0_9 = arith.constant 0 : index
    %c0_10 = arith.constant 0 : index
    %c0_11 = arith.constant 0 : index
    %10 = vector.load %arg3[%c0_9, %c0_10, %c0_11] : memref<1x256x128xf32, #tpu.memory_space<vmem>>, vector<1x256x128xf32>
    %11 = vector.shape_cast %10 : vector<1x256x128xf32> to vector<256x128xf32>
    %c0_12 = arith.constant 0 : index
    %c0_13 = arith.constant 0 : index
    %12 = vector.load %arg6[%c0_12, %c0_13] : memref<128x128xf32, #tpu.memory_space<vmem>>, vector<128x128xf32>
    %cst_14 = arith.constant dense<0.000000e+00> : vector<256x128xf32>
    %13 = tpu.matmul %11, %12, %cst_14 {dimension_numbers = #tpu.dot_dimension_numbers<[1], [0], [0], [1], [0, 0, 1, 1], [], []>} : vector<256x128xf32>, vector<128x128xf32>, vector<256x128xf32> -> vector<256x128xf32>
    %c0_15 = arith.constant 0 : index
    %c0_16 = arith.constant 0 : index
    %14 = vector.load %arg7[%c0_15, %c0_16] : memref<1x128xf32, #tpu.memory_space<vmem>>, vector<1x128xf32>
    %15 = vector.broadcast %14 : vector<1x128xf32> to vector<256x128xf32>
    %16 = arith.addf %13, %15 : vector<256x128xf32>
    %c0_17 = arith.constant 0 : index
    %c0_18 = arith.constant 0 : index
    %c0_19 = arith.constant 0 : index
    %17 = vector.load %arg9[%c0_17, %c0_18, %c0_19] : memref<1x256x128xf32, #tpu.memory_space<vmem>>, vector<1x256x128xf32>
    %18 = vector.shape_cast %17 : vector<1x256x128xf32> to vector<256x128xf32>
    %19 = vector.shape_cast %16 : vector<256x128xf32> to vector<1x256x128xf32>
    tpu.vector_store %arg9[%c0_17, %c0_18, %c0_19], %19 {strides = array<i32>} : memref<1x256x128xf32, #tpu.memory_space<vmem>>, vector<1x256x128xf32>,
    return
  }
  func.func @transform_0(%arg0: i32, %arg1: i32) -> (i32, i32, i32) {
    %c0_i32 = arith.constant 0 : i32
    %c0_i32_0 = arith.constant 0 : i32
    return %arg0, %arg1, %c0_i32 : i32, i32, i32
  }
  func.func @transform_1(%arg0: i32, %arg1: i32) -> (i32, i32, i32) {
    %c0_i32 = arith.constant 0 : i32
    %c0_i32_0 = arith.constant 0 : i32
    return %arg0, %arg1, %c0_i32 : i32, i32, i32
  }
  func.func @transform_2(%arg0: i32, %arg1: i32) -> (i32, i32) {
    %c0_i32 = arith.constant 0 : i32
    %c0_i32_0 = arith.constant 0 : i32
    %c0_i32_1 = arith.constant 0 : i32
    return %c0_i32, %c0_i32_0 : i32, i32
  }
  func.func @transform_3(%arg0: i32, %arg1: i32) -> (i32, i32) {
    %c0_i32 = arith.constant 0 : i32
    %c0_i32_0 = arith.constant 0 : i32
    %c0_i32_1 = arith.constant 0 : i32
    return %c0_i32, %c0_i32_0 : i32, i32
  }
  func.func @transform_4(%arg0: i32, %arg1: i32) -> (i32, i32) {
    %c0_i32 = arith.constant 0 : i32
    %c0_i32_0 = arith.constant 0 : i32
    %c0_i32_1 = arith.constant 0 : i32
    return %c0_i32, %c0_i32_0 : i32, i32
  }
  func.func @transform_5(%arg0: i32, %arg1: i32) -> (i32, i32) {
    %c0_i32 = arith.constant 0 : i32
    %c0_i32_0 = arith.constant 0 : i32
    %c0_i32_1 = arith.constant 0 : i32
    return %c0_i32, %c0_i32_0 : i32, i32
  }
  func.func @transform_6(%arg0: i32, %arg1: i32) -> (i32, i32, i32) {
    %c0_i32 = arith.constant 0 : i32
    %c0_i32_0 = arith.constant 0 : i32
    return %arg0, %arg1, %c0_i32 : i32, i32, i32
  }
  func.func @transform_7(%arg0: i32, %arg1: i32) -> (i32, i32, i32) {
    %c0_i32 = arith.constant 0 : i32
    %c0_i32_0 = arith.constant 0 : i32
    return %arg0, %arg1, %c0_i32 : i32, i32, i32
  }
}

</mosaic_0001>

<bundles_post_ra>
// kernel: tpu_custom_call.1
= control target key start
LH: loop header
LB: loop body
LE: loop exit
PB: predicated region body
PF: predicated region fallthrough
CT: control target
= control target key end

     0   :  { %s1947_s0 = inlined_call_operand.hbm [shape: f32[2,512,128], index: 0, kind: input, shape index: {}]   ;;  %s1948_s1 = inlined_call_operand.hbm [shape: f32[2,512,128], index: 1, kind: input, shape index: {}]   ;;  %s1949_s2 = inlined_call_operand.hbm [shape: f32[128,128], index: 2, kind: input, shape index: {}]   ;;  %s1950_s3 = inlined_call_operand.vmem [shape: f32[1,128], index: 3, kind: input, shape index: {}]   ;;  %s1951_s4 = inlined_call_operand.hbm [shape: f32[128,128], index: 4, kind: input, shape index: {}]   ;;  %s1952_s5 = inlined_call_operand.vmem [shape: f32[1,128], index: 5, kind: input, shape index: {}]   ;;  %s1953_s6 = inlined_call_operand.hbm [shape: f32[2,512,128], index: 6, kind: output, shape index: {0}]   ;;  %s1954_s7 = inlined_call_operand.hbm [shape: f32[2,512,128], index: 7, kind: output, shape index: {1}]  }
   0x1   :  { %1968 = sst [smem:[#allocation26_spill]] %s1949_s2 }
   0x2   :  { %1969 = sst [smem:[#allocation27_spill]] %s1951_s4 }
   0x3   :  { %1970 = sst [smem:[#allocation28_spill]] %s1953_s6 }
   0x4   :  { %1971 = sst [smem:[#allocation29_spill]] %s1954_s7 }
   0x5   :  { %13 = vsyncpa [#allocation3], 0 }
   0x6   :  { %15 = vsyncpa [#allocation3 + $0x1], 0 }
   0x7   :  { %16 = vsyncpa [#allocation6], 0 }
   0x8   :  { %18 = vsyncpa [#allocation6 + $0x1], 0 }
   0x9   :  { %19 = vsyncpa [#allocation9], 0 }
   0xa   :  { %20 = vsyncpa [#allocation4], 0 }
   0xb   :  { %22 = vsyncpa [#allocation4 + $0x1], 0 }
   0xc   :  { %23 = vsyncpa [#allocation12], 0 }
   0xd   :  { %25 = vsyncpa [#allocation12 + $0x1], 0  ;;  %s1508_s24 = smov 0   ;;  %s1510_s25 = smov 0  }
   0xe   :  { %s1512_s26 = smov 0   ;;  %s1514_s27 = smov 0  }
   0xf   :  { %s1516_s28 = smov 0   ;;  %s1518_s29 = smov 0  }
  0x10   :  { %s1520_s30 = smov 0   ;;  %s1522_s8 = smov 0  }
  0x11 LB: > { %1972 = sst [smem:[#allocation19_spill]] %s1432_s24  ;;  %s1549_s9 = sadd.s32 4294967295, %s1460_s8   ;;  %s1460_s8 = sphi %s1522_s8, %s31_s8   ;;  %s1456_s30 = sphi %s1520_s30, %s1998_s30   ;;  %s1452_s29 = sphi %s1518_s29, %s2003_s29   ;;  %s1448_s28 = sphi %s1516_s28, %s1996_s28   ;;  %s1444_s27 = sphi %s1514_s27, %s2002_s27   ;;  %s1440_s26 = sphi %s1512_s26, %s2001_s26   ;;  %s1436_s25 = sphi %s1510_s25, %s2000_s25   ;;  %s1432_s24 = sphi %s1508_s24, %s1999_s24  }
  0x12   : > { %1973 = sst [smem:[#allocation20_spill]] %s1448_s28  ;;  %s1021_s10 = sadd.s32 4294967294, %s1460_s8  }
  0x13   : > { %1974 = sst [smem:[#allocation21_spill]] %s1456_s30  ;;  %p65_p0 = scmp.ne.s32.totalorder %s1436_s25, %s1432_s24 }
  0x14   : > { %p66_p1 = scmp.eq.s32.totalorder %s1549_s9, 0  ;;  %p203_p2 = scmp.eq.s32.totalorder %s1549_s9, 3 }
  0x15   : > { %p209_p3 = scmp.eq.s32.totalorder %s1021_s10, 3  ;;  %p1022_p5 = scmp.ge.s32.totalorder %s1460_s8, 1 }
  0x16   : > { %p1558_p4 = por %p66_p1, %p65_p0  ;;  %p244_p7 = scmp.lt.s32.totalorder %s1460_s8, 5 }
  0x17   : > { %p1563_p6 = por %p209_p3, %p65_p0  ;;  %s1978_s2 = sld [smem:[#allocation26_spill]] }
  0x18   : > { %p1571_p8 = pnand %p1022_p5, %p244_p7  ;;  %s1462_s17 = smov [#allocation7]  }
  0x19   : > { %s1976_s12 = scalar_select %p1563_p6, 1, 0 }
  0x1a   : > { %p1099_p9 = pneg %p1571_p8  ;;  %s257_s18 = sshll.u32 %s1462_s17, 4  ;;  %s258_s18 = int_to_ptr.vmem [resolvable:$true] %s257_s18 }
  0x1b   : > { %1977 = sst [smem:[#allocation22_spill]] %s1976_s12  ;;  %s1955_s22 = smov 128  }
  0x1c   : > { %p1100_p10 = pnand %p1099_p9, %p66_p1  ;;  %s1980_s4 = sld [smem:[#allocation27_spill]] }
  0x1d   : > { %s255_s15 = sshll.u32 %s1978_s2, 4  ;;  %s1957_s23 = smov 8   ;;  %s256_s15 = int_to_ptr.hbm [resolvable:$true] %s255_s15 }
  0x1e   : > { %1102 = dma.hbm_to_vmem [thread:$0]  (!%p1100_p10), %s256_s15, 2048, %s258_s18, [#allocation6], %s1955_s22, %s1955_s22, %s1957_s23  }
  0x1f   : > { %s1465_s10 = smov [#allocation8]   ;;  %s40_s14 = sadd.s32 1, %s1452_s29 }
  0x20   : > { %s274_s13 = sshll.u32 %s1465_s10, 4  ;;  %s43_s17 = sadd.s32 1, %s1456_s30  ;;  %s275_s13 = int_to_ptr.vmem [resolvable:$true] %s274_s13 }
  0x21   : > { %p41_p11 = scmp.ge.s32.totalorder %s40_s14, 2  ;;  %s52_s19 = sadd.s32 1, %s1440_s26 }
  0x22   : > { %s272_s21 = sshll.u32 %s1980_s4, 4  ;;  %p59_p12 = scmp.ne.s32.totalorder %s1440_s26, %s1436_s25  ;;  %s273_s21 = int_to_ptr.hbm [resolvable:$true] %s272_s21 }
  0x23   : > { %1105 = dma.hbm_to_vmem [thread:$0]  (!%p1100_p10), %s273_s21, 2048, %s275_s13, [#allocation9], %s1955_s22, %s1955_s22, %s1957_s23  }
  0x24   : > { %p60_p13 = scmp.eq.s32.totalorder %s1460_s8, 0  ;;  %s2005_s14 = smov (%p41_p11, %s40_s14), 0 }
  0x25   : > { %1981 = sst [smem:[#allocation23_spill]] %s2005_s14  ;;  %s2007_s17 = smov (!%p41_p11, %s43_s17), %s1456_s30 }
  0x26   : > { %s48_s15 = ssub.s32 %s1452_s29, %s2005_s14  ;;  %p1599_p0 = por %p60_p13, %p59_p12 }
  0x27   : > { %p45_p3 = scmp.ge.s32.totalorder %s2007_s17, 2  ;;  %p1605_p5 = por %p203_p2, %p59_p12 }
  0x28   : > { %p1122_p7 = scmp.lt.s32.totalorder %s1460_s8, 4  ;;  %s291_s21 = sand.u32 1, %s1440_s26  }
  0x29   : > { %s1983_s20 = scalar_select %p1605_p5, 1, 0 }
  0x2a   : > { %s2009_s17 = smov (%p45_p3, %s2007_s17), 0  ;;  %s1026_s10 = sshll.u32 %s291_s21, 8 }
  0x2b   : > { %1984 = sst [smem:[#allocation24_spill]] %s1983_s20  ;;  %s47_s13 = ssub.s32 %s1456_s30, %s2009_s17 }
  0x2c   : > { %1985 = sst [smem:[#allocation25_spill]] %s2009_s17  ;;  %s49_s22 = sor.u32 %s48_s15, %s47_s13 }
  0x2d   : > { %s1027_s23 = sshll.u32 %s1452_s29, 5  ;;  %p50_p9 = scmp.eq.s32.totalorder %s49_s22, 0 }
  0x2e   : > { %s1028_s2 = sshll.u32 %s1456_s30, 6  ;;  %s295_s14 = scalar_lea.vmem [#allocation2], %s1026_s10 }
  0x2f   : > { %s300_s4 = sadd.s32 %s1028_s2, %s1027_s23  ;;  %s305_s12 = sshll.u32 %s295_s14, 4  ;;  %s306_s12 = int_to_ptr.vmem [resolvable:$true] %s305_s12 }
  0x30   : > { %s1618_s24 = scalar_select %p50_p9, %s1440_s26, %s52_s19  }
  0x31   : > { %s1029_s20 = sshll.u32 %s300_s4, 3  ;;  %p1107_p2 = pnand %p1122_p7, %p1599_p0 }
  0x32   : > { %s302_s28 = scalar_lea.hbm %s1947_s0, %s1029_s20  ;;  %s292_s15 = scalar_lea.sflag [#allocation3], %s291_s21 }
  0x33   : > { %s303_s17 = sshll.u32 %s302_s28, 4  ;;  %s1986_s22 = smov 8   ;;  %s304_s17 = int_to_ptr.hbm [resolvable:$true] %s303_s17 }
  0x34   : > { %s1987_s13 = smov 128   ;;  %s326_s14 = scalar_lea.hbm %s1948_s1, %s1029_s20 }
  0x35   : > { %1109 = dma.hbm_to_vmem [thread:$0]  (!%p1107_p2), %s304_s17, 4096, %s306_s12, %s292_s15, %s1987_s13, %s1987_s13, %s1986_s22  }
  0x36   : > { %s319_s4 = scalar_lea.vmem [#allocation5], %s1026_s10  ;;  %s327_s30 = sshll.u32 %s326_s14, 4  ;;  %s328_s30 = int_to_ptr.hbm [resolvable:$true] %s327_s30 }
  0x37   : > { %s329_s19 = sshll.u32 %s319_s4, 4  ;;  %s315_s6 = sand.u32 1, %s1460_s8   ;;  %s330_s19 = int_to_ptr.vmem [resolvable:$true] %s329_s19 }
  0x38   : > { %s316_s7 = scalar_lea.sflag [#allocation6], %s315_s6  ;;  %341 = sbr.rel (%p1571_p8) target bundleno = 372 (0x174), region = 44 }
  0x39   : > { %1112 = dma.hbm_to_vmem [thread:$0]  (!%p1107_p2), %s328_s30, 4096, %s330_s19, %s316_s7, %s1987_s13, %s1987_s13, %s1986_s22  }
  0x3a   : > { %s1640_s28 = sand.u32 (!%p1571_p8), 1, %s1436_s25  }
  0x3b   : > { %s1643_s12 = sshll.u32 (!%p1571_p8), %s1640_s28, 8  ;;  %s344_s17 = scalar_lea.sflag (!%p1571_p8), [#allocation3], %s1640_s28 }
  0x3c   : > { %s1647_s18 = scalar_lea.vmem (!%p1571_p8), [#allocation2], %s1643_s12 }
  0x3d   : > { %1407 = dma.done.wait (%p1558_p4), %s344_s17, 4096  }
  0x3e   : > { %1409 = vsyncadd (%p1558_p4), %s344_s17, 4294963200  ;;  %s353_s30 = sand.u32 1, %s1549_s9   ;;  %s1655_s20 = scalar_lea.vmem [#allocation5], %s1643_s12 }
  0x3f   : > { %s354_s16 = scalar_lea.sflag [#allocation6], %s353_s30 }
  0x40   : > { %1411 = dma.done.wait (%p1558_p4), %s354_s16, 4096  }
  0x41   : > { %1413 = vsyncadd (%p1558_p4), %s354_s16, 4294963200 }
  0x42   : > { %1415 = dma.done.wait (%p66_p1), [#allocation6], 2048  }
  0x43   : > { %1417 = vsyncadd (%p66_p1), [#allocation6], 4294965248 }
  0x44   : > { %1419 = dma.done.wait (%p66_p1), [#allocation9], 2048  }
  0x45   : > { %1421 = vsyncadd (%p66_p1), [#allocation9], 4294965248  ;;  %v460_v0 = vld [vmem:[#allocation7 + $0x78] sm:$0xff]  ;;  %v459_v2 = vld [vmem:[#allocation7 + $0x70] sm:$0xff]  ;;  %s1746_s15 = scalar_lea.vmem [#allocation10], %s1643_s12  ;;  %s1750_s22 = scalar_lea.vmem [#allocation11], %s1643_s12 }
  0x46   : > { %v657_v1 = vld [vmem:[#allocation8 + $0x78] sm:$0xff]  ;;  %1051 = vmatpush.msra.mxu2 %v460_v0  ;;  %v656_v3 = vld [vmem:[#allocation8 + $0x70] sm:$0xff]  ;;  %v458_v4 = vld [vmem:[#allocation7 + $0x68] sm:$0xff]  ;;  %465 = vmatpush.msra.mxu0 %v460_v0  ;;  %s1988_s13 = sld [smem:[#allocation20_spill]]  ;;  %s1043_s2 = sshll.u32 %s1444_s27, 5 }
  0x47   : > { %1067 = vmatpush.msra.mxu3 %v657_v1  ;;  %v655_v5 = vld [vmem:[#allocation8 + $0x68] sm:$0xff]  ;;  %662 = vmatpush.msra.mxu1 %v657_v1  ;;  %v457_v6 = vld [vmem:[#allocation7 + $0x60] sm:$0xff]  ;;  %v456_v8 = vld [vmem:[#allocation7 + $0x58] sm:$0xff]  ;;  %s1989_s6 = sld [smem:[#allocation28_spill]]  ;;  %s827_s12 = sshll.u32 %s1746_s15, 4  ;;  %s1881_s12 = int_to_ptr.vmem [resolvable:$true] %s827_s12 }
  0x48   : > { %1052 = vmatpush.msra.mxu2 %v459_v2  ;;  %v654_v7 = vld [vmem:[#allocation8 + $0x60] sm:$0xff]  ;;  %466 = vmatpush.msra.mxu0 %v459_v2  ;;  %v653_v9 = vld [vmem:[#allocation8 + $0x58] sm:$0xff]  ;;  %v455_v10 = vld [vmem:[#allocation7 + $0x50] sm:$0xff]  ;;  %s1990_s30 = sld [smem:[#allocation29_spill]]  ;;  %s846_s21 = sshll.u32 %s1750_s22, 4  ;;  %s1888_s21 = int_to_ptr.vmem [resolvable:$true] %s846_s21 }
  0x49   : > { %1068 = vmatpush.msra.mxu3 %v656_v3  ;;  %663 = vmatpush.msra.mxu1 %v656_v3  ;;  %v652_v11 = vld [vmem:[#allocation8 + $0x50] sm:$0xff]  ;;  %v454_v12 = vld [vmem:[#allocation7 + $0x48] sm:$0xff]  ;;  %v453_v14 = vld [vmem:[#allocation7 + $0x40] sm:$0xff] }
  0x4a   : > { %1053 = vmatpush.msra.mxu2 %v458_v4  ;;  %467 = vmatpush.msra.mxu0 %v458_v4  ;;  %v651_v13 = vld [vmem:[#allocation8 + $0x48] sm:$0xff]  ;;  %v650_v15 = vld [vmem:[#allocation8 + $0x40] sm:$0xff]  ;;  %v452_v16 = vld [vmem:[#allocation7 + $0x38] sm:$0xff] }
  0x4b   : > { %1069 = vmatpush.msra.mxu3 %v655_v5  ;;  %664 = vmatpush.msra.mxu1 %v655_v5  ;;  %v649_v17 = vld [vmem:[#allocation8 + $0x38] sm:$0xff]  ;;  %v451_v18 = vld [vmem:[#allocation7 + $0x30] sm:$0xff]  ;;  %v450_v20 = vld [vmem:[#allocation7 + $0x28] sm:$0xff] }
  0x4c   : > { %1054 = vmatpush.msra.mxu2 %v457_v6  ;;  %468 = vmatpush.msra.mxu0 %v457_v6  ;;  %v648_v19 = vld [vmem:[#allocation8 + $0x30] sm:$0xff]  ;;  %v647_v21 = vld [vmem:[#allocation8 + $0x28] sm:$0xff]  ;;  %v449_v22 = vld [vmem:[#allocation7 + $0x20] sm:$0xff]  ;;  %s1044_s23 = sshll.u32 %s1988_s13, 6  ;;  %s808_s13 = scalar_lea.sflag [#allocation4], %s1640_s28 }
  0x4d   : > { %1070 = vmatpush.msra.mxu3 %v654_v7  ;;  %665 = vmatpush.msra.mxu1 %v654_v7  ;;  %v646_v23 = vld [vmem:[#allocation8 + $0x20] sm:$0xff]  ;;  %v448_v24 = vld [vmem:[#allocation7 + $0x18] sm:$0xff]  ;;  %v447_v26 = vld [vmem:[#allocation7 + $0x10] sm:$0xff]  ;;  %s824_s14 = sadd.s32 %s1044_s23, %s1043_s2  ;;  %s1338_s27 = scalar_lea.hbm %s1989_s6, 1024 }
  0x4e   : > { %1055 = vmatpush.msra.mxu2 %v456_v8  ;;  %469 = vmatpush.msra.mxu0 %v456_v8  ;;  %v645_v25 = vld [vmem:[#allocation8 + $0x18] sm:$0xff]  ;;  %v644_v27 = vld [vmem:[#allocation8 + $0x10] sm:$0xff]  ;;  %v446_v28 = vld [vmem:[#allocation7 + $0x8] sm:$0xff]  ;;  %s1045_s4 = sshll.u32 %s824_s14, 3  ;;  %s1991_s16 = smov %s1990_s30 }
  0x4f   : > { %1071 = vmatpush.msra.mxu3 %v653_v9  ;;  %666 = vmatpush.msra.mxu1 %v653_v9  ;;  %v643_v29 = vld [vmem:[#allocation8 + $0x8] sm:$0xff]  ;;  %v445_v30 = vld [vmem:[#allocation7] sm:$0xff]  ;;  %v431_v40 = vld [vmem:[%s1647_s18 + $0x90] sm:$0xff]  ;;  %s826_s7 = scalar_lea.hbm %s1989_s6, %s1045_s4 }
  0x50   : > { %1056 = vmatpush.msra.mxu2 %v455_v10  ;;  %470 = vmatpush.msra.mxu0 %v455_v10  ;;  %v642_v31 = vld [vmem:[#allocation8] sm:$0xff]  ;;  %v430_v36 = vld [vmem:[%s1647_s18 + $0x88] sm:$0xff]  ;;  %v628_v41 = vld [vmem:[%s1655_s20 + $0x90] sm:$0xff]  ;;  %s829_s9 = sshll.u32 %s826_s7, 4  ;;  %s830_s9 = int_to_ptr.hbm [resolvable:$true] %s829_s9 }
  0x51   : > { %1072 = vmatpush.msra.mxu3 %v652_v11  ;;  %667 = vmatpush.msra.mxu1 %v652_v11  ;;  %v429_v32 = vld [vmem:[%s1647_s18 + $0x80] sm:$0xff]  ;;  %v627_v37 = vld [vmem:[%s1655_s20 + $0x88] sm:$0xff]  ;;  %v415_v42 = vld [vmem:[%s1647_s18 + $0x10] sm:$0xff]  ;;  %s1332_s2 = sshra.s32 %s830_s9, 4  ;;  %s1333_s2 = int_to_ptr.hbm [resolvable:$true] %s1332_s2 }
  0x52   : > { %1057 = vmatpush.msra.mxu2 %v454_v12  ;;  %471 = vmatpush.msra.mxu0 %v454_v12  ;;  %v626_v33 = vld [vmem:[%s1655_s20 + $0x80] sm:$0xff]  ;;  %v414_v38 = vld [vmem:[%s1647_s18 + $0x8] sm:$0xff]  ;;  %v612_v43 = vld [vmem:[%s1655_s20 + $0x10] sm:$0xff]  ;;  %s1334_s23 = scalar_lea.hbm %s1333_s2, 256  ;;  %p1339_p10 = scmp.lt.s32.totalorder %s1333_s2, %s1989_s6 }
  0x53   : > { %1073 = vmatpush.msra.mxu3 %v651_v13  ;;  %668 = vmatpush.msra.mxu1 %v651_v13  ;;  %v413_v34 = vld [vmem:[%s1647_s18] sm:$0xff]  ;;  %v611_v39 = vld [vmem:[%s1655_s20 + $0x8] sm:$0xff]  ;;  %v432_v44 = vld [vmem:[%s1647_s18 + $0x98] sm:$0xff]  ;;  %p1335_p1 = scmp.ne.s32.totalorder %s1333_s2, %s1334_s23  ;;  %p1340_p11 = scmp.lt.s32.totalorder %s1338_s27, %s1334_s23 }
  0x54   : > { %1058 = vmatpush.msra.mxu2 %v453_v14  ;;  %472 = vmatpush.msra.mxu0 %v453_v14  ;;  %v610_v35 = vld [vmem:[%s1655_s20] sm:$0xff]  ;;  %v629_v45 = vld [vmem:[%s1655_s20 + $0x98] sm:$0xff]  ;;  %v434_v52 = vld [vmem:[%s1647_s18 + $0xa8] sm:$0xff] }
  0x55   : > { %1074 = vmatpush.msra.mxu3 %v650_v15  ;;  %669 = vmatpush.msra.mxu1 %v650_v15  ;;  %v416_v46 = vld [vmem:[%s1647_s18 + $0x18] sm:$0xff]  ;;  %v433_v48 = vld [vmem:[%s1647_s18 + $0xa0] sm:$0xff]  ;;  %v631_v53 = vld [vmem:[%s1655_s20 + $0xa8] sm:$0xff]  ;;  %p1336_p4 = pnand %p1335_p1, %p1605_p5  ;;  %p1341_p12 = por %p1340_p11, %p1339_p10 }
  0x56   : > { %1059 = vmatpush.msra.mxu2 %v452_v16  ;;  %473 = vmatpush.msra.mxu0 %v452_v16  ;;  %v613_v47 = vld [vmem:[%s1655_s20 + $0x18] sm:$0xff]  ;;  %v630_v49 = vld [vmem:[%s1655_s20 + $0xa0] sm:$0xff]  ;;  %v418_v54 = vld [vmem:[%s1647_s18 + $0x28] sm:$0xff] }
  0x57   : > { %1075 = vmatpush.msra.mxu3 %v649_v17  ;;  %670 = vmatpush.msra.mxu1 %v649_v17  ;;  %v417_v50 = vld [vmem:[%s1647_s18 + $0x20] sm:$0xff]  ;;  %v615_v55 = vld [vmem:[%s1655_s20 + $0x28] sm:$0xff]  ;;  %v435_v56 = vld [vmem:[%s1647_s18 + $0xb0] sm:$0xff]  ;;  %p1337_p8 = pneg %p1336_p4 }
  0x58   : > { %1060 = vmatpush.msra.mxu2 %v451_v18  ;;  %474 = vmatpush.msra.mxu0 %v451_v18  ;;  %v614_v51 = vld [vmem:[%s1655_s20 + $0x20] sm:$0xff]  ;;  %v632_v57 = vld [vmem:[%s1655_s20 + $0xb0] sm:$0xff]  ;;  %v436_v60 = vld [vmem:[%s1647_s18 + $0xb8] sm:$0xff] }
  0x59   : > { %1076 = vmatpush.msra.mxu3 %v648_v19  ;;  %671 = vmatpush.msra.mxu1 %v648_v19  ;;  %v419_v58 = vld [vmem:[%s1647_s18 + $0x30] sm:$0xff]  ;;  %v633_v61 = vld [vmem:[%s1655_s20 + $0xb8] sm:$0xff]  ;;  %v437_v0 = vld [vmem:[%s1647_s18 + $0xc0] sm:$0xff]  ;;  %p1342_p13 = pnand %p1341_p12, %p1337_p8 }
  0x5a   : > { %1061 = vmatpush.msra.mxu2 %v450_v20  ;;  %475 = vmatpush.msra.mxu0 %v450_v20  ;;  %v616_v59 = vld [vmem:[%s1655_s20 + $0x30] sm:$0xff]  ;;  %v420_v62 = vld [vmem:[%s1647_s18 + $0x38] sm:$0xff]  ;;  %v634_v1 = vld [vmem:[%s1655_s20 + $0xc0] sm:$0xff] }
  0x5b   : > { %1077 = vmatpush.msra.mxu3 %v647_v21  ;;  %672 = vmatpush.msra.mxu1 %v647_v21  ;;  %v617_v63 = vld [vmem:[%s1655_s20 + $0x38] sm:$0xff]  ;;  %v421_v2 = vld [vmem:[%s1647_s18 + $0x40] sm:$0xff]  ;;  %v438_v4 = vld [vmem:[%s1647_s18 + $0xc8] sm:$0xff] }
  0x5c   : > { %1062 = vmatpush.msra.mxu2 %v449_v22  ;;  %476 = vmatpush.msra.mxu0 %v449_v22  ;;  %v618_v3 = vld [vmem:[%s1655_s20 + $0x40] sm:$0xff]  ;;  %v635_v5 = vld [vmem:[%s1655_s20 + $0xc8] sm:$0xff]  ;;  %v439_v8 = vld [vmem:[%s1647_s18 + $0xd0] sm:$0xff] }
  0x5d   : > { %1078 = vmatpush.msra.mxu3 %v646_v23  ;;  %673 = vmatpush.msra.mxu1 %v646_v23  ;;  %v422_v6 = vld [vmem:[%s1647_s18 + $0x48] sm:$0xff]  ;;  %v636_v9 = vld [vmem:[%s1655_s20 + $0xd0] sm:$0xff]  ;;  %v440_v12 = vld [vmem:[%s1647_s18 + $0xd8] sm:$0xff] }
  0x5e   : > { %1063 = vmatpush.msra.mxu2 %v448_v24  ;;  %477 = vmatpush.msra.mxu0 %v448_v24  ;;  %v619_v7 = vld [vmem:[%s1655_s20 + $0x48] sm:$0xff]  ;;  %v423_v10 = vld [vmem:[%s1647_s18 + $0x50] sm:$0xff]  ;;  %v637_v13 = vld [vmem:[%s1655_s20 + $0xd8] sm:$0xff] }
  0x5f   : > { %1079 = vmatpush.msra.mxu3 %v645_v25  ;;  %674 = vmatpush.msra.mxu1 %v645_v25  ;;  %v620_v11 = vld [vmem:[%s1655_s20 + $0x50] sm:$0xff]  ;;  %v424_v14 = vld [vmem:[%s1647_s18 + $0x58] sm:$0xff]  ;;  %v441_v16 = vld [vmem:[%s1647_s18 + $0xe0] sm:$0xff] }
  0x60   : > { %1064 = vmatpush.msra.mxu2 %v447_v26  ;;  %478 = vmatpush.msra.mxu0 %v447_v26  ;;  %v621_v15 = vld [vmem:[%s1655_s20 + $0x58] sm:$0xff]  ;;  %v638_v17 = vld [vmem:[%s1655_s20 + $0xe0] sm:$0xff]  ;;  %v442_v20 = vld [vmem:[%s1647_s18 + $0xe8] sm:$0xff] }
  0x61   : > { %1080 = vmatpush.msra.mxu3 %v644_v27  ;;  %675 = vmatpush.msra.mxu1 %v644_v27  ;;  %v425_v18 = vld [vmem:[%s1647_s18 + $0x60] sm:$0xff]  ;;  %v639_v21 = vld [vmem:[%s1655_s20 + $0xe8] sm:$0xff]  ;;  %v443_v24 = vld [vmem:[%s1647_s18 + $0xf0] sm:$0xff] }
  0x62   : > { %1065 = vmatpush.msra.mxu2 %v446_v28  ;;  %479 = vmatpush.msra.mxu0 %v446_v28  ;;  %v622_v19 = vld [vmem:[%s1655_s20 + $0x60] sm:$0xff]  ;;  %v426_v22 = vld [vmem:[%s1647_s18 + $0x68] sm:$0xff]  ;;  %v640_v25 = vld [vmem:[%s1655_s20 + $0xf0] sm:$0xff] }
  0x63   : > { %1081 = vmatpush.msra.mxu3 %v643_v29  ;;  %676 = vmatpush.msra.mxu1 %v643_v29  ;;  %v623_v23 = vld [vmem:[%s1655_s20 + $0x68] sm:$0xff]  ;;  %v427_v26 = vld [vmem:[%s1647_s18 + $0x70] sm:$0xff]  ;;  %v444_v28 = vld [vmem:[%s1647_s18 + $0xf8] sm:$0xff] }
  0x64   : > { %1066 = vmatpush.msra.mxu2 %v445_v30  ;;  %480 = vmatpush.msra.mxu0 %v445_v30  ;;  %v624_v27 = vld [vmem:[%s1655_s20 + $0x70] sm:$0xff]  ;;  %v641_v29 = vld [vmem:[%s1655_s20 + $0xf8] sm:$0xff] }
  0x65   : > { %1082 = vmatpush.msra.mxu3 %v642_v31  ;;  %529 = vmatmul.f32.vlgmr.msra.gmra.mxu2 %v429_v32  ;;  %v428_v30 = vld [vmem:[%s1647_s18 + $0x78] sm:$0xff]  ;;  %v1736_v32 = vld [vmem:[%s1950_s3] ss:$0 sm:$0xff] }
  0x66   : > { %726 = vmatmul.f32.vlgmr.msra.gmra.mxu3 %v626_v33  ;;  %677 = vmatpush.msra.mxu1 %v642_v31  ;;  %v625_v31 = vld [vmem:[%s1655_s20 + $0x78] sm:$0xff]  ;;  %v1741_v33 = vld [vmem:[%s1952_s5] ss:$0 sm:$0xff]  ;;  %s845_s20 = scalar_lea.hbm %s1990_s30, %s1045_s4 }
  0x67   : > { %481 = vmatmul.f32.vlgmr.msra.gmra.mxu0 %v413_v34  ;;  %678 = vmatmul.f32.vlgmr.msra.gmra.mxu1 %v610_v35  ;;  %s848_s10 = sshll.u32 %s845_s20, 4  ;;  %s1890_s10 = int_to_ptr.hbm [resolvable:$true] %s848_s10 }
  0x6d   : > { %532 = vmatmul.f32.gmra.mxu2 %v430_v36 }
  0x6e   : > { %729 = vmatmul.f32.gmra.mxu3 %v627_v37 }
  0x6f   : > { %484 = vmatmul.f32.gmra.mxu0 %v414_v38  ;;  %681 = vmatmul.f32.gmra.mxu1 %v611_v39 }
  0x75   : > { %535 = vmatmul.f32.gmra.mxu2 %v431_v40 }
  0x76   : > { %732 = vmatmul.f32.gmra.mxu3 %v628_v41 }
  0x77   : > { %487 = vmatmul.f32.gmra.mxu0 %v415_v42  ;;  %684 = vmatmul.f32.gmra.mxu1 %v612_v43 }
  0x7d   : > { %538 = vmatmul.f32.gmra.mxu2 %v432_v44 }
  0x7e   : > { %735 = vmatmul.f32.gmra.mxu3 %v629_v45 }
  0x7f   : > { %490 = vmatmul.f32.gmra.mxu0 %v416_v46  ;;  %687 = vmatmul.f32.gmra.mxu1 %v613_v47 }
  0x85   : > { %541 = vmatmul.f32.gmra.mxu2 %v433_v48 }
  0x86   : > { %738 = vmatmul.f32.gmra.mxu3 %v630_v49 }
  0x87   : > { %493 = vmatmul.f32.gmra.mxu0 %v417_v50  ;;  %690 = vmatmul.f32.gmra.mxu1 %v614_v51 }
  0x8d   : > { %544 = vmatmul.f32.gmra.mxu2 %v434_v52 }
  0x8e   : > { %741 = vmatmul.f32.gmra.mxu3 %v631_v53 }
  0x8f   : > { %496 = vmatmul.f32.gmra.mxu0 %v418_v54  ;;  %693 = vmatmul.f32.gmra.mxu1 %v615_v55 }
  0x95   : > { %547 = vmatmul.f32.gmra.mxu2 %v435_v56 }
  0x96   : > { %744 = vmatmul.f32.gmra.mxu3 %v632_v57 }
  0x97   : > { %499 = vmatmul.f32.gmra.mxu0 %v419_v58  ;;  %696 = vmatmul.f32.gmra.mxu1 %v616_v59 }
  0x9d   : > { %550 = vmatmul.f32.gmra.mxu2 %v436_v60 }
  0x9e   : > { %747 = vmatmul.f32.gmra.mxu3 %v633_v61 }
  0x9f   : > { %502 = vmatmul.f32.gmra.mxu0 %v420_v62  ;;  %699 = vmatmul.f32.gmra.mxu1 %v617_v63 }
  0xa5   : > { %553 = vmatmul.f32.gmra.mxu2 %v437_v0 }
  0xa6   : > { %750 = vmatmul.f32.gmra.mxu3 %v634_v1 }
  0xa7   : > { %505 = vmatmul.f32.gmra.mxu0 %v421_v2  ;;  %702 = vmatmul.f32.gmra.mxu1 %v618_v3 }
  0xad   : > { %556 = vmatmul.f32.gmra.mxu2 %v438_v4 }
  0xae   : > { %753 = vmatmul.f32.gmra.mxu3 %v635_v5 }
  0xaf   : > { %508 = vmatmul.f32.gmra.mxu0 %v422_v6  ;;  %705 = vmatmul.f32.gmra.mxu1 %v619_v7 }
  0xb5   : > { %559 = vmatmul.f32.gmra.mxu2 %v439_v8 }
  0xb6   : > { %756 = vmatmul.f32.gmra.mxu3 %v636_v9 }
  0xb7   : > { %511 = vmatmul.f32.gmra.mxu0 %v423_v10  ;;  %708 = vmatmul.f32.gmra.mxu1 %v620_v11 }
  0xbd   : > { %562 = vmatmul.f32.gmra.mxu2 %v440_v12 }
  0xbe   : > { %759 = vmatmul.f32.gmra.mxu3 %v637_v13 }
  0xbf   : > { %514 = vmatmul.f32.gmra.mxu0 %v424_v14  ;;  %711 = vmatmul.f32.gmra.mxu1 %v621_v15 }
  0xc5   : > { %565 = vmatmul.f32.gmra.mxu2 %v441_v16 }
  0xc6   : > { %762 = vmatmul.f32.gmra.mxu3 %v638_v17 }
  0xc7   : > { %517 = vmatmul.f32.gmra.mxu0 %v425_v18  ;;  %714 = vmatmul.f32.gmra.mxu1 %v622_v19 }
  0xcd   : > { %568 = vmatmul.f32.gmra.mxu2 %v442_v20 }
  0xce   : > { %765 = vmatmul.f32.gmra.mxu3 %v639_v21 }
  0xcf   : > { %520 = vmatmul.f32.gmra.mxu0 %v426_v22  ;;  %717 = vmatmul.f32.gmra.mxu1 %v623_v23 }
  0xd5   : > { %571 = vmatmul.f32.gmra.mxu2 %v443_v24 }
  0xd6   : > { %768 = vmatmul.f32.gmra.mxu3 %v640_v25 }
  0xd7   : > { %523 = vmatmul.f32.gmra.mxu0 %v427_v26  ;;  %720 = vmatmul.f32.gmra.mxu1 %v624_v27 }
  0xdd   : > { %574 = vmatmul.f32.gmra.mxu2 %v444_v28 }
  0xde   : > { %771 = vmatmul.f32.gmra.mxu3 %v641_v29 }
  0xdf   : > { %526 = vmatmul.f32.gmra.mxu0 %v428_v30  ;;  %723 = vmatmul.f32.gmra.mxu1 %v625_v31 }
  0xe4   : > { %v482_v34 = vpop.f32.mrf.mxu0  ;;  %v679_v35 = vpop.f32.mrf.mxu1 }
  0xe5   : > { %v483_v36 = vadd.f32 %v1736_v32, %v482_v34  ;;  %v680_v37 = vadd.f32 %v1741_v33, %v679_v35 }
  0xe7   : > { %578 = vst [vmem:[%s1746_s15] sm:$0xff] %v483_v36 }
  0xe8   : > { %v530_v38 = vpop.f32.mrf.mxu2  ;;  %775 = vst [vmem:[%s1750_s22] sm:$0xff] %v680_v37 }
  0xe9   : > { %v727_v39 = vpop.f32.mrf.mxu3  ;;  %v531_v40 = vadd.f32 %v1736_v32, %v530_v38 }
  0xea   : > { %v728_v41 = vadd.f32 %v1741_v33, %v727_v39 }
  0xeb   : > { %594 = vst [vmem:[%s1746_s15 + $0x80] sm:$0xff] %v531_v40 }
  0xec   : > { %791 = vst [vmem:[%s1750_s22 + $0x80] sm:$0xff] %v728_v41  ;;  %v485_v42 = vpop.f32.mrf.mxu0  ;;  %v682_v43 = vpop.f32.mrf.mxu1 }
  0xed   : > { %v486_v44 = vadd.f32 %v1736_v32, %v485_v42  ;;  %v683_v45 = vadd.f32 %v1741_v33, %v682_v43 }
  0xef   : > { %579 = vst [vmem:[%s1746_s15 + $0x8] sm:$0xff] %v486_v44 }
  0xf0   : > { %v533_v46 = vpop.f32.mrf.mxu2  ;;  %776 = vst [vmem:[%s1750_s22 + $0x8] sm:$0xff] %v683_v45 }
  0xf1   : > { %v730_v47 = vpop.f32.mrf.mxu3  ;;  %v534_v48 = vadd.f32 %v1736_v32, %v533_v46 }
  0xf2   : > { %v731_v49 = vadd.f32 %v1741_v33, %v730_v47 }
  0xf3   : > { %595 = vst [vmem:[%s1746_s15 + $0x88] sm:$0xff] %v534_v48 }
  0xf4   : > { %792 = vst [vmem:[%s1750_s22 + $0x88] sm:$0xff] %v731_v49  ;;  %v488_v50 = vpop.f32.mrf.mxu0  ;;  %v685_v51 = vpop.f32.mrf.mxu1 }
  0xf5   : > { %v489_v52 = vadd.f32 %v1736_v32, %v488_v50  ;;  %v686_v53 = vadd.f32 %v1741_v33, %v685_v51 }
  0xf7   : > { %580 = vst [vmem:[%s1746_s15 + $0x10] sm:$0xff] %v489_v52 }
  0xf8   : > { %v536_v54 = vpop.f32.mrf.mxu2  ;;  %777 = vst [vmem:[%s1750_s22 + $0x10] sm:$0xff] %v686_v53 }
  0xf9   : > { %v733_v55 = vpop.f32.mrf.mxu3  ;;  %v537_v56 = vadd.f32 %v1736_v32, %v536_v54 }
  0xfa   : > { %v734_v57 = vadd.f32 %v1741_v33, %v733_v55 }
  0xfb   : > { %596 = vst [vmem:[%s1746_s15 + $0x90] sm:$0xff] %v537_v56 }
  0xfc   : > { %793 = vst [vmem:[%s1750_s22 + $0x90] sm:$0xff] %v734_v57  ;;  %v491_v58 = vpop.f32.mrf.mxu0  ;;  %v688_v59 = vpop.f32.mrf.mxu1 }
  0xfd   : > { %v492_v60 = vadd.f32 %v1736_v32, %v491_v58  ;;  %v689_v61 = vadd.f32 %v1741_v33, %v688_v59 }
  0xff   : > { %581 = vst [vmem:[%s1746_s15 + $0x18] sm:$0xff] %v492_v60 }
 0x100   : > { %v539_v62 = vpop.f32.mrf.mxu2  ;;  %778 = vst [vmem:[%s1750_s22 + $0x18] sm:$0xff] %v689_v61 }
 0x101   : > { %v736_v63 = vpop.f32.mrf.mxu3  ;;  %v540_v0 = vadd.f32 %v1736_v32, %v539_v62 }
 0x102   : > { %v737_v1 = vadd.f32 %v1741_v33, %v736_v63 }
 0x103   : > { %597 = vst [vmem:[%s1746_s15 + $0x98] sm:$0xff] %v540_v0 }
 0x104   : > { %794 = vst [vmem:[%s1750_s22 + $0x98] sm:$0xff] %v737_v1  ;;  %v494_v2 = vpop.f32.mrf.mxu0  ;;  %v691_v3 = vpop.f32.mrf.mxu1 }
 0x105   : > { %v495_v4 = vadd.f32 %v1736_v32, %v494_v2  ;;  %v692_v5 = vadd.f32 %v1741_v33, %v691_v3 }
 0x107   : > { %582 = vst [vmem:[%s1746_s15 + $0x20] sm:$0xff] %v495_v4 }
 0x108   : > { %v542_v6 = vpop.f32.mrf.mxu2  ;;  %779 = vst [vmem:[%s1750_s22 + $0x20] sm:$0xff] %v692_v5 }
 0x109   : > { %v739_v7 = vpop.f32.mrf.mxu3  ;;  %v543_v8 = vadd.f32 %v1736_v32, %v542_v6 }
 0x10a   : > { %v740_v9 = vadd.f32 %v1741_v33, %v739_v7 }
 0x10b   : > { %598 = vst [vmem:[%s1746_s15 + $0xa0] sm:$0xff] %v543_v8 }
 0x10c   : > { %795 = vst [vmem:[%s1750_s22 + $0xa0] sm:$0xff] %v740_v9  ;;  %v497_v10 = vpop.f32.mrf.mxu0  ;;  %v694_v11 = vpop.f32.mrf.mxu1 }
 0x10d   : > { %v498_v12 = vadd.f32 %v1736_v32, %v497_v10  ;;  %v695_v13 = vadd.f32 %v1741_v33, %v694_v11 }
 0x10f   : > { %583 = vst [vmem:[%s1746_s15 + $0x28] sm:$0xff] %v498_v12 }
 0x110   : > { %v545_v14 = vpop.f32.mrf.mxu2  ;;  %780 = vst [vmem:[%s1750_s22 + $0x28] sm:$0xff] %v695_v13 }
 0x111   : > { %v742_v15 = vpop.f32.mrf.mxu3  ;;  %v546_v16 = vadd.f32 %v1736_v32, %v545_v14 }
 0x112   : > { %v743_v17 = vadd.f32 %v1741_v33, %v742_v15 }
 0x113   : > { %599 = vst [vmem:[%s1746_s15 + $0xa8] sm:$0xff] %v546_v16 }
 0x114   : > { %796 = vst [vmem:[%s1750_s22 + $0xa8] sm:$0xff] %v743_v17  ;;  %v500_v18 = vpop.f32.mrf.mxu0  ;;  %v697_v19 = vpop.f32.mrf.mxu1 }
 0x115   : > { %v501_v20 = vadd.f32 %v1736_v32, %v500_v18  ;;  %v698_v21 = vadd.f32 %v1741_v33, %v697_v19 }
 0x117   : > { %584 = vst [vmem:[%s1746_s15 + $0x30] sm:$0xff] %v501_v20 }
 0x118   : > { %v548_v22 = vpop.f32.mrf.mxu2  ;;  %781 = vst [vmem:[%s1750_s22 + $0x30] sm:$0xff] %v698_v21 }
 0x119   : > { %v745_v23 = vpop.f32.mrf.mxu3  ;;  %v549_v24 = vadd.f32 %v1736_v32, %v548_v22 }
 0x11a   : > { %v746_v25 = vadd.f32 %v1741_v33, %v745_v23 }
 0x11b   : > { %600 = vst [vmem:[%s1746_s15 + $0xb0] sm:$0xff] %v549_v24 }
 0x11c   : > { %797 = vst [vmem:[%s1750_s22 + $0xb0] sm:$0xff] %v746_v25  ;;  %v503_v26 = vpop.f32.mrf.mxu0  ;;  %v700_v27 = vpop.f32.mrf.mxu1 }
 0x11d   : > { %v504_v28 = vadd.f32 %v1736_v32, %v503_v26  ;;  %v701_v29 = vadd.f32 %v1741_v33, %v700_v27 }
 0x11f   : > { %585 = vst [vmem:[%s1746_s15 + $0x38] sm:$0xff] %v504_v28 }
 0x120   : > { %v551_v30 = vpop.f32.mrf.mxu2  ;;  %782 = vst [vmem:[%s1750_s22 + $0x38] sm:$0xff] %v701_v29 }
 0x121   : > { %v748_v31 = vpop.f32.mrf.mxu3  ;;  %v552_v34 = vadd.f32 %v1736_v32, %v551_v30 }
 0x122   : > { %v749_v35 = vadd.f32 %v1741_v33, %v748_v31 }
 0x123   : > { %601 = vst [vmem:[%s1746_s15 + $0xb8] sm:$0xff] %v552_v34 }
 0x124   : > { %798 = vst [vmem:[%s1750_s22 + $0xb8] sm:$0xff] %v749_v35  ;;  %v506_v36 = vpop.f32.mrf.mxu0  ;;  %v703_v37 = vpop.f32.mrf.mxu1 }
 0x125   : > { %v507_v38 = vadd.f32 %v1736_v32, %v506_v36  ;;  %v704_v39 = vadd.f32 %v1741_v33, %v703_v37 }
 0x127   : > { %586 = vst [vmem:[%s1746_s15 + $0x40] sm:$0xff] %v507_v38 }
 0x128   : > { %v554_v40 = vpop.f32.mrf.mxu2  ;;  %783 = vst [vmem:[%s1750_s22 + $0x40] sm:$0xff] %v704_v39 }
 0x129   : > { %v751_v41 = vpop.f32.mrf.mxu3  ;;  %v555_v42 = vadd.f32 %v1736_v32, %v554_v40 }
 0x12a   : > { %v752_v43 = vadd.f32 %v1741_v33, %v751_v41 }
 0x12b   : > { %602 = vst [vmem:[%s1746_s15 + $0xc0] sm:$0xff] %v555_v42 }
 0x12c   : > { %799 = vst [vmem:[%s1750_s22 + $0xc0] sm:$0xff] %v752_v43  ;;  %v509_v44 = vpop.f32.mrf.mxu0  ;;  %v706_v45 = vpop.f32.mrf.mxu1 }
 0x12d   : > { %v510_v46 = vadd.f32 %v1736_v32, %v509_v44  ;;  %v707_v47 = vadd.f32 %v1741_v33, %v706_v45 }
 0x12f   : > { %587 = vst [vmem:[%s1746_s15 + $0x48] sm:$0xff] %v510_v46 }
 0x130   : > { %v557_v48 = vpop.f32.mrf.mxu2  ;;  %784 = vst [vmem:[%s1750_s22 + $0x48] sm:$0xff] %v707_v47 }
 0x131   : > { %v754_v49 = vpop.f32.mrf.mxu3  ;;  %v558_v50 = vadd.f32 %v1736_v32, %v557_v48 }
 0x132   : > { %v755_v51 = vadd.f32 %v1741_v33, %v754_v49 }
 0x133   : > { %603 = vst [vmem:[%s1746_s15 + $0xc8] sm:$0xff] %v558_v50 }
 0x134   : > { %800 = vst [vmem:[%s1750_s22 + $0xc8] sm:$0xff] %v755_v51  ;;  %v512_v52 = vpop.f32.mrf.mxu0  ;;  %v709_v53 = vpop.f32.mrf.mxu1 }
 0x135   : > { %v513_v54 = vadd.f32 %v1736_v32, %v512_v52  ;;  %v710_v55 = vadd.f32 %v1741_v33, %v709_v53 }
 0x137   : > { %588 = vst [vmem:[%s1746_s15 + $0x50] sm:$0xff] %v513_v54 }
 0x138   : > { %v560_v56 = vpop.f32.mrf.mxu2  ;;  %785 = vst [vmem:[%s1750_s22 + $0x50] sm:$0xff] %v710_v55 }
 0x139   : > { %v757_v57 = vpop.f32.mrf.mxu3  ;;  %v561_v58 = vadd.f32 %v1736_v32, %v560_v56 }
 0x13a   : > { %v758_v59 = vadd.f32 %v1741_v33, %v757_v57 }
 0x13b   : > { %604 = vst [vmem:[%s1746_s15 + $0xd0] sm:$0xff] %v561_v58 }
 0x13c   : > { %801 = vst [vmem:[%s1750_s22 + $0xd0] sm:$0xff] %v758_v59  ;;  %v515_v60 = vpop.f32.mrf.mxu0  ;;  %v712_v61 = vpop.f32.mrf.mxu1 }
 0x13d   : > { %v516_v62 = vadd.f32 %v1736_v32, %v515_v60  ;;  %v713_v63 = vadd.f32 %v1741_v33, %v712_v61 }
 0x13f   : > { %589 = vst [vmem:[%s1746_s15 + $0x58] sm:$0xff] %v516_v62 }
 0x140   : > { %v563_v0 = vpop.f32.mrf.mxu2  ;;  %786 = vst [vmem:[%s1750_s22 + $0x58] sm:$0xff] %v713_v63 }
 0x141   : > { %v760_v1 = vpop.f32.mrf.mxu3  ;;  %v564_v2 = vadd.f32 %v1736_v32, %v563_v0 }
 0x142   : > { %v761_v3 = vadd.f32 %v1741_v33, %v760_v1 }
 0x143   : > { %605 = vst [vmem:[%s1746_s15 + $0xd8] sm:$0xff] %v564_v2 }
 0x144   : > { %802 = vst [vmem:[%s1750_s22 + $0xd8] sm:$0xff] %v761_v3  ;;  %v518_v4 = vpop.f32.mrf.mxu0  ;;  %v715_v5 = vpop.f32.mrf.mxu1 }
 0x145   : > { %v519_v6 = vadd.f32 %v1736_v32, %v518_v4  ;;  %v716_v7 = vadd.f32 %v1741_v33, %v715_v5 }
 0x147   : > { %590 = vst [vmem:[%s1746_s15 + $0x60] sm:$0xff] %v519_v6 }
 0x148   : > { %v566_v8 = vpop.f32.mrf.mxu2  ;;  %787 = vst [vmem:[%s1750_s22 + $0x60] sm:$0xff] %v716_v7 }
 0x149   : > { %v763_v9 = vpop.f32.mrf.mxu3  ;;  %v567_v10 = vadd.f32 %v1736_v32, %v566_v8 }
 0x14a   : > { %v764_v11 = vadd.f32 %v1741_v33, %v763_v9 }
 0x14b   : > { %606 = vst [vmem:[%s1746_s15 + $0xe0] sm:$0xff] %v567_v10 }
 0x14c   : > { %803 = vst [vmem:[%s1750_s22 + $0xe0] sm:$0xff] %v764_v11  ;;  %v521_v12 = vpop.f32.mrf.mxu0  ;;  %v718_v13 = vpop.f32.mrf.mxu1 }
 0x14d   : > { %v522_v14 = vadd.f32 %v1736_v32, %v521_v12  ;;  %v719_v15 = vadd.f32 %v1741_v33, %v718_v13 }
 0x14f   : > { %591 = vst [vmem:[%s1746_s15 + $0x68] sm:$0xff] %v522_v14 }
 0x150   : > { %v569_v16 = vpop.f32.mrf.mxu2  ;;  %788 = vst [vmem:[%s1750_s22 + $0x68] sm:$0xff] %v719_v15 }
 0x151   : > { %v766_v17 = vpop.f32.mrf.mxu3  ;;  %v570_v18 = vadd.f32 %v1736_v32, %v569_v16 }
 0x152   : > { %v767_v19 = vadd.f32 %v1741_v33, %v766_v17 }
 0x153   : > { %607 = vst [vmem:[%s1746_s15 + $0xe8] sm:$0xff] %v570_v18 }
 0x154   : > { %804 = vst [vmem:[%s1750_s22 + $0xe8] sm:$0xff] %v767_v19  ;;  %v524_v20 = vpop.f32.mrf.mxu0  ;;  %v721_v21 = vpop.f32.mrf.mxu1 }
 0x155   : > { %v525_v22 = vadd.f32 %v1736_v32, %v524_v20  ;;  %v722_v23 = vadd.f32 %v1741_v33, %v721_v21 }
 0x157   : > { %592 = vst [vmem:[%s1746_s15 + $0x70] sm:$0xff] %v525_v22 }
 0x158   : > { %v572_v24 = vpop.f32.mrf.mxu2  ;;  %789 = vst [vmem:[%s1750_s22 + $0x70] sm:$0xff] %v722_v23 }
 0x159   : > { %v769_v25 = vpop.f32.mrf.mxu3  ;;  %v573_v26 = vadd.f32 %v1736_v32, %v572_v24 }
 0x15a   : > { %v770_v27 = vadd.f32 %v1741_v33, %v769_v25 }
 0x15b   : > { %608 = vst [vmem:[%s1746_s15 + $0xf0] sm:$0xff] %v573_v26 }
 0x15c   : > { %805 = vst [vmem:[%s1750_s22 + $0xf0] sm:$0xff] %v770_v27  ;;  %v527_v28 = vpop.f32.mrf.mxu0  ;;  %v724_v29 = vpop.f32.mrf.mxu1 }
 0x15d   : > { %v528_v30 = vadd.f32 %v1736_v32, %v527_v28  ;;  %v725_v31 = vadd.f32 %v1741_v33, %v724_v29 }
 0x15f   : > { %593 = vst [vmem:[%s1746_s15 + $0x78] sm:$0xff] %v528_v30 }
 0x160   : > { %v575_v34 = vpop.f32.mrf.mxu2  ;;  %790 = vst [vmem:[%s1750_s22 + $0x78] sm:$0xff] %v725_v31 }
 0x161   : > { %v772_v35 = vpop.f32.mrf.mxu3  ;;  %v576_v36 = vadd.f32 %v1736_v32, %v575_v34 }
 0x162   : > { %v773_v37 = vadd.f32 %v1741_v33, %v772_v35 }
 0x163   : > { %609 = vst [vmem:[%s1746_s15 + $0xf8] sm:$0xff] %v576_v36 }
 0x164   : > { %806 = vst [vmem:[%s1750_s22 + $0xf8] sm:$0xff] %v773_v37 }
 0x165   : > { %1345 = shalt.err (!%p1342_p13)
}
 0x166   : > { %s1466_s15 = smov 128   ;;  %s1467_s22 = smov 8  }
 0x167   : > { %1095 = dma.vmem_to_hbm [thread:$0]  (%p1605_p5), %s1881_s12, 4096, %s830_s9, %s808_s13, %s1466_s15, %s1466_s15, %s1467_s22  }
 0x168   : > { %s813_s17 = scalar_lea.sflag [#allocation12], %s1640_s28  ;;  %s1360_s18 = sshra.s32 %s1890_s10, 4  ;;  %s1361_s18 = int_to_ptr.hbm [resolvable:$true] %s1360_s18 }
 0x169   : > { %s1362_s30 = scalar_lea.hbm %s1361_s18, 256  ;;  %s1366_s23 = scalar_lea.hbm %s1991_s16, 1024 }
 0x16a   : > { %p1363_p0 = scmp.ne.s32.totalorder %s1361_s18, %s1362_s30  ;;  %p1367_p9 = scmp.lt.s32.totalorder %s1361_s18, %s1991_s16 }
 0x16b   : > { %p1368_p2 = scmp.lt.s32.totalorder %s1366_s23, %s1362_s30 }
 0x16c   : > { %p1364_p3 = pnand %p1363_p0, %p1605_p5 }
 0x16d   : > { %p1369_p1 = por %p1368_p2, %p1367_p9 }
 0x16e   : > { %p1365_p7 = pneg %p1364_p3 }
 0x170   : > { %p1370_p4 = pnand %p1369_p1, %p1365_p7 }
 0x172   : > { %1373 = shalt.err (!%p1370_p4)
}
 0x173   : > { %1096 = dma.vmem_to_hbm [thread:$0]  (%p1605_p5), %s1888_s21, 4096, %s1890_s10, %s813_s17, %s1466_s15, %s1466_s15, %s1467_s22  }
 0x174 PF: > { %s1993_s28 = sld [smem:[#allocation19_spill]]  ;;  %p1125_p8 = scmp.ge.s32.totalorder %s1460_s8, 2 }
 0x176   : > { %p1114_p10 = pnand %p1125_p8, %p1563_p6 }
 0x178   : > { %p1115_p11 = pneg %p1114_p10 }
 0x17a   : > { %s863_s9 = sand.u32 1, %s1993_s28  }
 0x17b   : > { %s864_s13 = scalar_lea.sflag [#allocation4], %s863_s9 }
 0x17c   : > { %1423 = dma.done.wait (%p1115_p11), %s864_s13, 4096  }
 0x17d   : > { %1425 = vsyncadd (%p1115_p11), %s864_s13, 4294963200  ;;  %s874_s27 = scalar_lea.sflag [#allocation12], %s863_s9 }
 0x17e   : > { %1427 = dma.done.wait (%p1115_p11), %s874_s27, 4096  }
 0x17f   : > { %1429 = vsyncadd (%p1115_p11), %s874_s27, 4294963200  ;;  %s31_s8 = sadd.s32 1, %s1460_s8   ;;  %s1995_s11 = smov %s1618_s24 }
 0x180   : > { %p28_p12 = scmp.ge.s32.totalorder %s31_s8, 6   ;;  %s1996_s28 = sld [smem:[#allocation21_spill]] }
 0x181   : > { %s1997_s21 = sld [smem:[#allocation23_spill]]  ;;  %s1999_s24 = smov %s1436_s25 }
 0x182   : > { %s1998_s30 = sld [smem:[#allocation25_spill]]  ;;  %s2000_s25 = smov %s1440_s26 }
 0x183   : > { %s2001_s26 = smov %s1995_s11  ;;  %s2002_s27 = smov %s1452_s29 }
 0x184   :  { %30 = sbr.rel (!%p28_p12) target bundleno = 17 (0x11), region = 127 }
 0x187   : > { %s2003_s29 = smov %s1997_s21 }
 0x189   :  { %880 = vsyncpa [#allocation3], 1 }
 0x18a   :  { %882 = vsyncpa [#allocation3 + $0x1], 1 }
 0x18b   :  { %883 = vsyncpa [#allocation6], 1 }
 0x18c   :  { %885 = vsyncpa [#allocation6 + $0x1], 1 }
 0x18d   :  { %886 = vsyncpa [#allocation9], 1 }
 0x18e   :  { %887 = vsyncpa [#allocation4], 1 }
 0x18f   :  { %889 = vsyncpa [#allocation4 + $0x1], 1 }
 0x190   :  { %890 = vsyncpa [#allocation12], 1 }
 0x191   :  { %892 = vsyncpa [#allocation12 + $0x1], 1 }

</bundles_post_ra>
